<compile_context>
chip_gen: v7x
topology: tpu7x:2x2x1
jax: 0.10.0
libtpu: 0.0.40
codegen_flags: <defaults>
</compile_context>

<pallas_src>
import functools

import jax
import jax.numpy as jnp
from jax import lax
from jax.experimental import pallas as pl
from jax.experimental.pallas import tpu as pltpu


# Scoped-VMEM budget: explicit, with headroom on every generation
# (v7x TensorCore has 64 MiB physical VMEM; v5e/v6e have 128 MiB).
_VMEM_LIMIT = 48 * 1024 * 1024

# Contract the leading (node) axis of both operands:  s^T @ y  without an
# explicit transpose (lowers to a native transposed-LHS MXU matmul).
_CONTRACT0 = (((0,), (0,)), ((), ()))


# --------------------------------------------------------------------------
# Block 0 (tiled), pass A: stream adj row strips once; produce
#   s (per strip, to HBM), x_out = s^T h, mask_out = clip(s^T mask),
#   p = s^T adj  (accumulated in a VMEM f32 scratch, written once as bf16).
# --------------------------------------------------------------------------
def _enc_pass_a_kernel(x_ref, adj_ref, mask_ref, w_cat_ref, b_cat_ref,
                       s_ref, xo_ref, mo_ref, p_ref, p_acc, *, d_model):
    i = pl.program_id(1)

    @pl.when(i == 0)
    def _init():
        xo_ref[...] = jnp.zeros_like(xo_ref)
        mo_ref[...] = jnp.zeros_like(mo_ref)
        p_acc[...] = jnp.zeros_like(p_acc)

    adj_t = adj_ref[0]                       # (T, N_in)   bf16
    x = x_ref[0]                             # (N_in, D)   bf16 (resident)
    mask_t = mask_ref[0]                     # (T, 1)      f32

    # message passing on the row strip (bf16 MXU, f32 accumulate)
    ax = jnp.dot(adj_t, x, preferred_element_type=jnp.float32)      # (T, D)

    # single fused matmul for embed + assign:  ax @ [W_embed | W_assign]
    z = jnp.dot(ax.astype(jnp.bfloat16), w_cat_ref[...],
                preferred_element_type=jnp.float32) + b_cat_ref[...]
    h = jax.nn.relu(z[:, :d_model]) * mask_t                        # (T, D)

    # masked softmax over out_nodes (f32 elementwise; fully-masked rows are
    # zeroed by s * mask below, so no -1e9 select is needed)
    logits = z[:, d_model:]                                         # (T, N_out)
    logits = logits - jnp.max(logits, axis=-1, keepdims=True)
    e = jnp.exp(logits)
    s = (e / jnp.sum(e, axis=-1, keepdims=True)) * mask_t           # f32
    s_b = s.astype(jnp.bfloat16)
    s_ref[0] = s_b                                                  # bf16 to HBM

    # accumulate pooled features / pooled mask into resident output blocks
    xo_ref[0] += lax.dot_general(
        s_b, h.astype(jnp.bfloat16),
        dimension_numbers=_CONTRACT0, preferred_element_type=jnp.float32)
    mo_ref[0] += lax.dot_general(
        s, mask_t, dimension_numbers=_CONTRACT0,
        preferred_element_type=jnp.float32)

    # accumulate p = s^T @ adj in f32 VMEM scratch (adj read only once!)
    p_acc[...] += lax.dot_general(
        s_b, adj_t, dimension_numbers=_CONTRACT0,
        preferred_element_type=jnp.float32)

    @pl.when(i == pl.num_programs(1) - 1)
    def _finalize():
        mo_ref[0] = jnp.clip(mo_ref[0], 0.0, 1.0)
        p_ref[0] = p_acc[...].astype(p_ref.dtype)


# --------------------------------------------------------------------------
# Block 0, pass B:  adj_out = p @ s  (one small matmul per batch element)
# --------------------------------------------------------------------------
def _enc_pass_b_kernel(p_ref, s_ref, adj_out_ref):
    adj_out_ref[0] = jnp.dot(p_ref[0], s_ref[0],
                             preferred_element_type=jnp.float32)


def geom_encoder_block_tiled(x, adj, mask, w_cat, b_cat, *, row_tile=None):
    """Tiled GeomEncoderBlock.  adj is streamed as (row_tile, N_in) strips."""
    B, n_in, d = x.shape
    n_out = w_cat.shape[1] - d
    if row_tile is None:
        # <=512 keeps v7x (64 MiB VMEM) comfortable at full 4096-node scale.
        row_tile = min(n_in, 512)
    assert n_in % row_tile == 0 and row_tile % 8 == 0
    n_tiles = n_in // row_tile

    x_b = x.astype(jnp.bfloat16)         # halve resident x, no per-strip cast
    adj_b = adj.astype(jnp.bfloat16)     # halve adj HBM traffic / VMEM
    w_cat_b = w_cat.astype(jnp.bfloat16)

    # --- pass A: s, x_out, mask_out, p = s^T adj ---------------------------
    s, x_out, mask_out, p = pl.pallas_call(
        functools.partial(_enc_pass_a_kernel, d_model=d),
        grid=(B, n_tiles),
        in_specs=[
            pl.BlockSpec((1, n_in, d), lambda b, i: (b, 0, 0)),        # x (full)
            pl.BlockSpec((1, row_tile, n_in), lambda b, i: (b, i, 0)),  # adj strip
            pl.BlockSpec((1, row_tile, 1), lambda b, i: (b, i, 0)),    # mask strip
            pl.BlockSpec((d, d + n_out), lambda b, i: (0, 0)),         # fused W
            pl.BlockSpec((1, d + n_out), lambda b, i: (0, 0)),         # fused b
        ],
        out_specs=(
            pl.BlockSpec((1, row_tile, n_out), lambda b, i: (b, i, 0)),  # s strip
            pl.BlockSpec((1, n_out, d), lambda b, i: (b, 0, 0)),         # x_out acc
            pl.BlockSpec((1, n_out, 1), lambda b, i: (b, 0, 0)),         # mask acc
            pl.BlockSpec((1, n_out, n_in), lambda b, i: (b, 0, 0)),      # p = s^T adj
        ),
        out_shape=(
            jax.ShapeDtypeStruct((B, n_in, n_out), jnp.bfloat16),
            jax.ShapeDtypeStruct((B, n_out, d), jnp.float32),
            jax.ShapeDtypeStruct((B, n_out, 1), jnp.float32),
            jax.ShapeDtypeStruct((B, n_out, n_in), jnp.bfloat16),
        ),
        scratch_shapes=[pltpu.VMEM((n_out, n_in), jnp.float32)],
        compiler_params=pltpu.CompilerParams(
            dimension_semantics=("parallel", "arbitrary"),
            vmem_limit_bytes=_VMEM_LIMIT),
    )(x_b, adj_b, mask, w_cat_b, b_cat)

    # --- pass B: adj_out = p @ s  (adj itself is never re-read) ------------
    adj_out = pl.pallas_call(
        _enc_pass_b_kernel,
        grid=(B,),
        in_specs=[
            pl.BlockSpec((1, n_out, n_in), lambda b: (b, 0, 0)),
            pl.BlockSpec((1, n_in, n_out), lambda b: (b, 0, 0)),
        ],
        out_specs=pl.BlockSpec((1, n_out, n_out), lambda b: (b, 0, 0)),
        out_shape=jax.ShapeDtypeStruct((B, n_out, n_out), jnp.float32),
        compiler_params=pltpu.CompilerParams(
            dimension_semantics=("parallel",),
            vmem_limit_bytes=_VMEM_LIMIT),
    )(p, s)

    return x_out, adj_out, mask_out


# --------------------------------------------------------------------------
# Fused tail kernel: remaining (small) encoder blocks + GGNN, one call, grid=(B,)
# --------------------------------------------------------------------------
def _tail_kernel(*refs, num_tail_blocks, num_steps):
    n_in_refs = 3 + 2 * num_tail_blocks + 6
    in_refs = refs[:n_in_refs]
    xf_ref, ao_ref, adjo_ref, mo_ref = refs[n_in_refs:]

    x = in_refs[0][0]          # (n, d)   f32
    adj = in_refs[1][0]        # (n, n)   f32
    mask = in_refs[2][0]       # (n, 1)   f32
    d = x.shape[-1]

    # ---- small encoder blocks (whole working set lives in VMEM) ----------
    widx = 3
    for _ in range(num_tail_blocks):
        w_cat = in_refs[widx][...]         # (d, d + n_out) bf16
        b_cat = in_refs[widx + 1][...]     # (1, d + n_out) f32
        widx += 2

        adj_b = adj.astype(jnp.bfloat16)
        ax = jnp.dot(adj_b, x.astype(jnp.bfloat16),
                     preferred_element_type=jnp.float32)
        z = jnp.dot(ax.astype(jnp.bfloat16), w_cat,
                    preferred_element_type=jnp.float32) + b_cat
        h = jax.nn.relu(z[:, :d]) * mask
        logits = z[:, d:]
        logits = logits - jnp.max(logits, axis=-1, keepdims=True)
        e = jnp.exp(logits)
        s = (e / jnp.sum(e, axis=-1, keepdims=True)) * mask
        s_b = s.astype(jnp.bfloat16)

        x = lax.dot_general(s_b, h.astype(jnp.bfloat16),
                            dimension_numbers=_CONTRACT0,
                            preferred_element_type=jnp.float32)
        adj_s = jnp.dot(adj_b, s_b, preferred_element_type=jnp.float32)
        adj = lax.dot_general(s_b, adj_s.astype(jnp.bfloat16),
                              dimension_numbers=_CONTRACT0,
                              preferred_element_type=jnp.float32)
        mask = jnp.clip(lax.dot_general(s, mask, dimension_numbers=_CONTRACT0,
                                        preferred_element_type=jnp.float32),
                        0.0, 1.0)

    adjo_ref[0] = adj
    mo_ref[0] = mask

    # ---- GGNN: fused-gate GRU propagation, collect intermediates ---------
    w_msg = in_refs[widx][...]          # (d, d)   bf16
    b_msg = in_refs[widx + 1][...]      # (1, d)   f32
    w_gates = in_refs[widx + 2][...]    # (d, 3d)  bf16   [W_z | W_r | W_h]
    b_gates = in_refs[widx + 3][...]    # (1, 3d)  f32    [b_z | b_r | b_h]
    u_zr = in_refs[widx + 4][...]       # (d, 2d)  bf16   [U_z | U_r]
    u_h = in_refs[widx + 5][...]        # (d, d)   bf16

    adj_b = adj.astype(jnp.bfloat16)
    outs = []
    # TODO(synk): switch to lax.fori_loop with a dynamic all_outs store if
    # num_steps grows large (keeps vreg pressure / code size flat).
    for _t in range(num_steps):
        xb = x.astype(jnp.bfloat16)
        m = jnp.dot(adj_b,
                    jnp.dot(xb, w_msg,
                            preferred_element_type=jnp.float32).astype(jnp.bfloat16),
                    preferred_element_type=jnp.float32) + b_msg
        g_m = jnp.dot(m.astype(jnp.bfloat16), w_gates,
                      preferred_element_type=jnp.float32) + b_gates   # (n, 3d)
        g_x = jnp.dot(xb, u_zr, preferred_element_type=jnp.float32)   # (n, 2d)
        zg = jax.nn.sigmoid(g_m[:, :d] + g_x[:, :d])
        rg = jax.nn.sigmoid(g_m[:, d:2 * d] + g_x[:, d:])
        h_til = jnp.tanh(
            g_m[:, 2 * d:]
            + jnp.dot((rg * x).astype(jnp.bfloat16), u_h,
                      preferred_element_type=jnp.float32))
        x = ((1.0 - zg) * x + zg * h_til) * mask
        outs.append(x)

    xf_ref[0] = x
    # single dense slab store of all intermediates (lane/sublane dense)
    ao_ref[0] = jnp.concatenate(outs, axis=0)


def geom_tail_fused(x, adj, mask, tail_weights, ggnn_fused, num_steps):
    B, n1, d = x.shape
    num_tail_blocks = len(tail_weights)
    n_last = (tail_weights[-1][0].shape[1] - d) if num_tail_blocks else n1

    def batched(shape):
        nd = len(shape)
        return pl.BlockSpec((1,) + shape, lambda b, _nd=nd: (b,) + (0,) * _nd)

    def shared(shape):
        nd = len(shape)
        return pl.BlockSpec(shape, lambda b, _nd=nd: (0,) * _nd)

    in_specs = [batched((n1, d)), batched((n1, n1)), batched((n1, 1))]
    args = [x, adj, mask]
    for w_cat, b_cat in tail_weights:
        in_specs += [shared(w_cat.shape), shared(b_cat.shape)]
        args += [w_cat, b_cat]
    for a in ggnn_fused:
        in_specs.append(shared(a.shape))
        args.append(a)

    kernel = functools.partial(_tail_kernel,
                               num_tail_blocks=num_tail_blocks,
                               num_steps=num_steps)

    x_final, all_flat, adj_out, mask_out = pl.pallas_call(
        kernel,
        grid=(B,),
        in_specs=in_specs,
        out_specs=(
            batched((n_last, d)),
            batched((num_steps * n_last, d)),
            batched((n_last, n_last)),
            batched((n_last, 1)),
        ),
        out_shape=(
            jax.ShapeDtypeStruct((B, n_last, d), jnp.float32),
            jax.ShapeDtypeStruct((B, num_steps * n_last, d), jnp.float32),
            jax.ShapeDtypeStruct((B, n_last, n_last), jnp.float32),
            jax.ShapeDtypeStruct((B, n_last, 1), jnp.float32),
        ),
        compiler_params=pltpu.CompilerParams(
            dimension_semantics=("parallel",),
            vmem_limit_bytes=_VMEM_LIMIT),
    )(*args)

    all_outs = all_flat.reshape(B, num_steps, n_last, d)
    return x_final, all_outs, adj_out, mask_out


# --------------------------------------------------------------------------
# Parameter init + weight fusion + stack forward (plain-JAX glue)
# --------------------------------------------------------------------------
def init_params(key, d_model, node_sizes, num_steps):
    del num_steps  # GGNN weights are shared across steps
    params = {"encoder_blocks": [], "ggnn": {}}
    n_blocks = len(node_sizes) - 1
    keys = jax.random.split(key, n_blocks + 1)
    scale = 0.05

    for i in range(n_blocks):
        n_out = node_sizes[i + 1]
        k = jax.random.split(keys[i], 4)
        params["encoder_blocks"].append({
            "w_embed": scale * jax.random.normal(k[0], (d_model, d_model), jnp.float32),
            "b_embed": scale * jax.random.normal(k[1], (1, d_model), jnp.float32),
            "w_assign": scale * jax.random.normal(k[2], (d_model, n_out), jnp.float32),
            "b_assign": scale * jax.random.normal(k[3], (1, n_out), jnp.float32),
        })

    k = jax.random.split(keys[-1], 11)
    names = ["w_msg", "b_msg", "w_z", "u_z", "b_z",
             "w_r", "u_r", "b_r", "w_h", "u_h", "b_h"]
    g = {}
    for name, kk in zip(names, k):
        shape = (1, d_model) if name.startswith("b") else (d_model, d_model)
        g[name] = scale * jax.random.normal(kk, shape, jnp.float32)
    params["ggnn"] = g
    return params


def _fuse_encoder_weights(p):
    w_cat = jnp.concatenate([p["w_embed"], p["w_assign"]], axis=1)
    b_cat = jnp.concatenate([p["b_embed"], p["b_assign"]], axis=1)
    return w_cat, b_cat


def _fuse_ggnn_weights(g):
    w_msg = g["w_msg"].astype(jnp.bfloat16)
    b_msg = g["b_msg"]
    w_gates = jnp.concatenate([g["w_z"], g["w_r"], g["w_h"]], axis=1).astype(jnp.bfloat16)
    b_gates = jnp.concatenate([g["b_z"], g["b_r"], g["b_h"]], axis=1)
    u_zr = jnp.concatenate([g["u_z"], g["u_r"]], axis=1).astype(jnp.bfloat16)
    u_h = g["u_h"].astype(jnp.bfloat16)
    return (w_msg, b_msg, w_gates, b_gates, u_zr, u_h)


def geom_encoder_stack(x, adj, mask, params, num_steps, *, block0_row_tile=None):
    enc = params["encoder_blocks"]

    # block 0: large block, tiled over adjacency row strips (adj read once)
    w_cat0, b_cat0 = _fuse_encoder_weights(enc[0])
    x, adj, mask = geom_encoder_block_tiled(x, adj, mask, w_cat0, b_cat0,
                                            row_tile=block0_row_tile)

    # blocks 1.. + GGNN: fused into one kernel (whole working set fits VMEM)
    tail_weights = []
    for p in enc[1:]:
        w_cat, b_cat = _fuse_encoder_weights(p)
        tail_weights.append((w_cat.astype(jnp.bfloat16), b_cat))
    ggnn_fused = _fuse_ggnn_weights(params["ggnn"])

    x_final, all_gnn_outs, adj_out, mask_out = geom_tail_fused(
        x, adj, mask, tail_weights, ggnn_fused, num_steps)
    return x_final, all_gnn_outs, adj_out, mask_out


# --------------------------------------------------------------------------
if __name__ == "__main__":
    B, D = 2, 32
    # scaled-down node schedule (original: 4096 -> 1024 -> 256 -> 64)
    node_sizes = [64, 32, 16, 8]
    NUM_STEPS = 3
    ROW_TILE = 32        # 2 row tiles on block 0 -> exercises the tiled path

    key = jax.random.PRNGKey(0)
    k_x, k_adj, k_p = jax.random.split(key, 3)

    N0 = node_sizes[0]
    x = jax.random.normal(k_x, (B, N0, D), jnp.float32)
    a = jax.random.uniform(k_adj, (B, N0, N0), jnp.float32)
    adj = 0.5 * (a + jnp.swapaxes(a, 1, 2))          # symmetric adjacency
    mask = jnp.ones((B, N0, 1), jnp.float32)
    mask = mask.at[:, N0 - 8:, :].set(0.0)           # pad last 8 nodes
    adj = adj * mask * jnp.swapaxes(mask, 1, 2)      # zero padded rows/cols

    params = init_params(k_p, D, node_sizes, NUM_STEPS)

    x_final, all_gnn_outs, adj_out, mask_out = geom_encoder_stack(
        x, adj, mask, params, NUM_STEPS, block0_row_tile=ROW_TILE)
    jax.block_until_ready((x_final, all_gnn_outs, adj_out, mask_out))

    assert x_final.shape == (B, node_sizes[-1], D)
    assert all_gnn_outs.shape == (B, NUM_STEPS, node_sizes[-1], D)
    assert adj_out.shape == (B, node_sizes[-1], node_sizes[-1])
    assert mask_out.shape == (B, node_sizes[-1], 1)
    assert bool(jnp.all(jnp.isfinite(x_final)))
    assert bool(jnp.all(jnp.isfinite(all_gnn_outs)))
    assert bool(jnp.all(jnp.isfinite(adj_out)))
    print("KERNEL_OK")
</pallas_src>

<mosaic_0001>
module attributes {stable_mosaic.version = 11 : i64} {
  func.func @_enc_pass_a_kernel(%arg0: i32, %arg1: i32, %arg2: memref<1x64x32xbf16, #tpu.memory_space<vmem>>, %arg3: memref<1x32x64xbf16, #tpu.memory_space<vmem>>, %arg4: memref<1x32x1xf32, #tpu.memory_space<vmem>>, %arg5: memref<32x64xbf16, #tpu.memory_space<vmem>>, %arg6: memref<1x64xf32, #tpu.memory_space<vmem>>, %arg7: memref<1x32x32xbf16, #tpu.memory_space<vmem>>, %arg8: memref<1x32x32xf32, #tpu.memory_space<vmem>>, %arg9: memref<1x32x1xf32, #tpu.memory_space<vmem>>, %arg10: memref<1x32x64xbf16, #tpu.memory_space<vmem>>, %arg11: memref<32x64xf32, #tpu.memory_space<vmem>>) attributes {dimension_semantics = [#tpu.dimension_semantics<parallel>, #tpu.dimension_semantics<arbitrary>], iteration_bounds = array<i64: 2, 2>, scalar_prefetch = 0 : i64, scratch_operands = 1 : i64, tpu.core_type = #tpu.core_type<tc>, window_params = [{transform_indices = @transform_0, window_bounds = array<i64: 1, 64, 32>}, {transform_indices = @transform_1, window_bounds = array<i64: 1, 32, 64>}, {transform_indices = @transform_2, window_bounds = array<i64: 1, 32, 1>}, {pipeline_mode = #tpu.pipeline_mode<synchronous>, transform_indices = @transform_3, window_bounds = array<i64: 32, 64>}, {pipeline_mode = #tpu.pipeline_mode<synchronous>, transform_indices = @transform_4, window_bounds = array<i64: 1, 64>}, {transform_indices = @transform_5, window_bounds = array<i64: 1, 32, 32>}, {transform_indices = @transform_6, window_bounds = array<i64: 1, 32, 32>}, {transform_indices = @transform_7, window_bounds = array<i64: 1, 32, 1>}, {transform_indices = @transform_8, window_bounds = array<i64: 1, 32, 64>}]} {
    %c0_i32 = arith.constant 0 : i32
    %0 = arith.cmpi eq, %arg1, %c0_i32 : i32
    %1 = arith.extui %0 : i1 to i32
    %c0_i32_0 = arith.constant 0 : i32
    %2 = arith.cmpi ne, %1, %c0_i32_0 : i32
    scf.if %2 {
      %cst_40 = arith.constant 0.000000e+00 : f32
      %59 = vector.broadcast %cst_40 : f32 to vector<1x32x32xf32>
      %c0_41 = arith.constant 0 : index
      %c0_42 = arith.constant 0 : index
      %c0_43 = arith.constant 0 : index
      %60 = vector.load %arg8[%c0_41, %c0_42, %c0_43] : memref<1x32x32xf32, #tpu.memory_space<vmem>>, vector<1x32x32xf32>
      tpu.vector_store %arg8[%c0_41, %c0_42, %c0_43], %59 {strides = array<i32>} : memref<1x32x32xf32, #tpu.memory_space<vmem>>, vector<1x32x32xf32>,
      %cst_44 = arith.constant 0.000000e+00 : f32
      %61 = vector.broadcast %cst_44 : f32 to vector<1x32x1xf32>
      %c0_45 = arith.constant 0 : index
      %c0_46 = arith.constant 0 : index
      %c0_47 = arith.constant 0 : index
      %62 = vector.load %arg9[%c0_45, %c0_46, %c0_47] : memref<1x32x1xf32, #tpu.memory_space<vmem>>, vector<1x32x1xf32>
      tpu.vector_store %arg9[%c0_45, %c0_46, %c0_47], %61 {strides = array<i32>} : memref<1x32x1xf32, #tpu.memory_space<vmem>>, vector<1x32x1xf32>,
      %cst_48 = arith.constant 0.000000e+00 : f32
      %63 = vector.broadcast %cst_48 : f32 to vector<32x64xf32>
      %c0_49 = arith.constant 0 : index
      %c0_50 = arith.constant 0 : index
      %64 = vector.load %arg11[%c0_49, %c0_50] : memref<32x64xf32, #tpu.memory_space<vmem>>, vector<32x64xf32>
      tpu.vector_store %arg11[%c0_49, %c0_50], %63 {strides = array<i32>} : memref<32x64xf32, #tpu.memory_space<vmem>>, vector<32x64xf32>,
    } else {
    }
    %c0 = arith.constant 0 : index
    %c0_1 = arith.constant 0 : index
    %c0_2 = arith.constant 0 : index
    %3 = vector.load %arg3[%c0, %c0_1, %c0_2] : memref<1x32x64xbf16, #tpu.memory_space<vmem>>, vector<1x32x64xbf16>
    %4 = vector.shape_cast %3 : vector<1x32x64xbf16> to vector<32x64xbf16>
    %c0_3 = arith.constant 0 : index
    %c0_4 = arith.constant 0 : index
    %c0_5 = arith.constant 0 : index
    %5 = vector.load %arg2[%c0_3, %c0_4, %c0_5] : memref<1x64x32xbf16, #tpu.memory_space<vmem>>, vector<1x64x32xbf16>
    %6 = vector.shape_cast %5 : vector<1x64x32xbf16> to vector<64x32xbf16>
    %c0_6 = arith.constant 0 : index
    %c0_7 = arith.constant 0 : index
    %c0_8 = arith.constant 0 : index
    %7 = vector.load %arg4[%c0_6, %c0_7, %c0_8] : memref<1x32x1xf32, #tpu.memory_space<vmem>>, vector<1x32x1xf32>
    %8 = vector.shape_cast %7 : vector<1x32x1xf32> to vector<32x1xf32>
    %cst = arith.constant dense<0.000000e+00> : vector<32x32xf32>
    %9 = tpu.matmul %4, %6, %cst {dimension_numbers = #tpu.dot_dimension_numbers<[1], [0], [0], [1], [0, 0, 1, 1], [], []>} : vector<32x64xbf16>, vector<64x32xbf16>, vector<32x32xf32> -> vector<32x32xf32>
    %10 = arith.truncf %9 : vector<32x32xf32> to vector<32x32xbf16>
    %c0_9 = arith.constant 0 : index
    %c0_10 = arith.constant 0 : index
    %11 = vector.load %arg5[%c0_9, %c0_10] : memref<32x64xbf16, #tpu.memory_space<vmem>>, vector<32x64xbf16>
    %cst_11 = arith.constant dense<0.000000e+00> : vector<32x64xf32>
    %12 = tpu.matmul %10, %11, %cst_11 {dimension_numbers = #tpu.dot_dimension_numbers<[1], [0], [0], [1], [0, 0, 1, 1], [], []>} : vector<32x32xbf16>, vector<32x64xbf16>, vector<32x64xf32> -> vector<32x64xf32>
    %c0_12 = arith.constant 0 : index
    %c0_13 = arith.constant 0 : index
    %13 = vector.load %arg6[%c0_12, %c0_13] : memref<1x64xf32, #tpu.memory_space<vmem>>, vector<1x64xf32>
    %14 = vector.broadcast %13 : vector<1x64xf32> to vector<32x64xf32>
    %15 = arith.addf %12, %14 : vector<32x64xf32>
    %16 = vector.extract_strided_slice %15 {offsets = [0, 0], sizes = [32, 32], strides = [1, 1]} : vector<32x64xf32> to vector<32x32xf32>
    %cst_14 = arith.constant 0.000000e+00 : f32
    %17 = vector.broadcast %cst_14 : f32 to vector<32x32xf32>
    %18 = arith.maximumf %16, %17 : vector<32x32xf32>
    %19 = vector.broadcast %8 : vector<32x1xf32> to vector<32x32xf32>
    %20 = arith.mulf %18, %19 : vector<32x32xf32>
    %21 = vector.extract_strided_slice %15 {offsets = [0, 32], sizes = [32, 32], strides = [1, 1]} : vector<32x64xf32> to vector<32x32xf32>
    %cst_15 = arith.constant dense<0xFF800000> : vector<32xf32>
    %22 = vector.multi_reduction <maximumf>, %21, %cst_15 [1] : vector<32x32xf32> to vector<32xf32>
    %23 = vector.shape_cast %22 : vector<32xf32> to vector<32x1xf32>
    %24 = vector.broadcast %23 : vector<32x1xf32> to vector<32x32xf32>
    %25 = arith.subf %21, %24 : vector<32x32xf32>
    %26 = math.exp %25 : vector<32x32xf32>
    %cst_16 = arith.constant dense<0.000000e+00> : vector<32xf32>
    %27 = vector.multi_reduction <add>, %26, %cst_16 [1] : vector<32x32xf32> to vector<32xf32>
    %28 = vector.shape_cast %27 : vector<32xf32> to vector<32x1xf32>
    %29 = vector.broadcast %28 : vector<32x1xf32> to vector<32x32xf32>
    %30 = arith.divf %26, %29 : vector<32x32xf32>
    %31 = vector.broadcast %8 : vector<32x1xf32> to vector<32x32xf32>
    %32 = arith.mulf %30, %31 : vector<32x32xf32>
    %33 = arith.truncf %32 : vector<32x32xf32> to vector<32x32xbf16>
    %c0_17 = arith.constant 0 : index
    %c0_18 = arith.constant 0 : index
    %c0_19 = arith.constant 0 : index
    %34 = vector.load %arg7[%c0_17, %c0_18, %c0_19] : memref<1x32x32xbf16, #tpu.memory_space<vmem>>, vector<1x32x32xbf16>
    %35 = vector.shape_cast %34 : vector<1x32x32xbf16> to vector<32x32xbf16>
    %36 = vector.shape_cast %33 : vector<32x32xbf16> to vector<1x32x32xbf16>
    tpu.vector_store %arg7[%c0_17, %c0_18, %c0_19], %36 {strides = array<i32>} : memref<1x32x32xbf16, #tpu.memory_space<vmem>>, vector<1x32x32xbf16>,
    %c0_20 = arith.constant 0 : index
    %c0_21 = arith.constant 0 : index
    %c0_22 = arith.constant 0 : index
    %37 = vector.load %arg8[%c0_20, %c0_21, %c0_22] : memref<1x32x32xf32, #tpu.memory_space<vmem>>, vector<1x32x32xf32>
    %38 = vector.shape_cast %37 : vector<1x32x32xf32> to vector<32x32xf32>
    %39 = arith.truncf %20 : vector<32x32xf32> to vector<32x32xbf16>
    %cst_23 = arith.constant dense<0.000000e+00> : vector<32x32xf32>
    %40 = tpu.matmul %33, %39, %cst_23 {dimension_numbers = #tpu.dot_dimension_numbers<[0], [0], [1], [1], [0, 1, 1, 1], [], []>} : vector<32x32xbf16>, vector<32x32xbf16>, vector<32x32xf32> -> vector<32x32xf32>
    %41 = arith.addf %38, %40 : vector<32x32xf32>
    %c0_24 = arith.constant 0 : index
    %c0_25 = arith.constant 0 : index
    %c0_26 = arith.constant 0 : index
    %42 = vector.load %arg8[%c0_24, %c0_25, %c0_26] : memref<1x32x32xf32, #tpu.memory_space<vmem>>, vector<1x32x32xf32>
    %43 = vector.shape_cast %42 : vector<1x32x32xf32> to vector<32x32xf32>
    %44 = vector.shape_cast %41 : vector<32x32xf32> to vector<1x32x32xf32>
    tpu.vector_store %arg8[%c0_24, %c0_25, %c0_26], %44 {strides = array<i32>} : memref<1x32x32xf32, #tpu.memory_space<vmem>>, vector<1x32x32xf32>,
    %c0_27 = arith.constant 0 : index
    %c0_28 = arith.constant 0 : index
    %c0_29 = arith.constant 0 : index
    %45 = vector.load %arg9[%c0_27, %c0_28, %c0_29] : memref<1x32x1xf32, #tpu.memory_space<vmem>>, vector<1x32x1xf32>
    %46 = vector.shape_cast %45 : vector<1x32x1xf32> to vector<32x1xf32>
    %cst_30 = arith.constant dense<0.000000e+00> : vector<32x1xf32>
    %47 = tpu.matmul %32, %8, %cst_30 {dimension_numbers = #tpu.dot_dimension_numbers<[0], [0], [1], [1], [0, 1, 1, 1], [], []>} : vector<32x32xf32>, vector<32x1xf32>, vector<32x1xf32> -> vector<32x1xf32>
    %48 = arith.addf %46, %47 : vector<32x1xf32>
    %c0_31 = arith.constant 0 : index
    %c0_32 = arith.constant 0 : index
    %c0_33 = arith.constant 0 : index
    %49 = vector.load %arg9[%c0_31, %c0_32, %c0_33] : memref<1x32x1xf32, #tpu.memory_space<vmem>>, vector<1x32x1xf32>
    %50 = vector.shape_cast %49 : vector<1x32x1xf32> to vector<32x1xf32>
    %51 = vector.shape_cast %48 : vector<32x1xf32> to vector<1x32x1xf32>
    tpu.vector_store %arg9[%c0_31, %c0_32, %c0_33], %51 {strides = array<i32>} : memref<1x32x1xf32, #tpu.memory_space<vmem>>, vector<1x32x1xf32>,
    %c0_34 = arith.constant 0 : index
    %c0_35 = arith.constant 0 : index
    %52 = vector.load %arg11[%c0_34, %c0_35] : memref<32x64xf32, #tpu.memory_space<vmem>>, vector<32x64xf32>
    %cst_36 = arith.constant dense<0.000000e+00> : vector<32x64xf32>
    %53 = tpu.matmul %33, %4, %cst_36 {dimension_numbers = #tpu.dot_dimension_numbers<[0], [0], [1], [1], [0, 1, 1, 1], [], []>} : vector<32x32xbf16>, vector<32x64xbf16>, vector<32x64xf32> -> vector<32x64xf32>
    %54 = arith.addf %52, %53 : vector<32x64xf32>
    %c0_37 = arith.constant 0 : index
    %c0_38 = arith.constant 0 : index
    %55 = vector.load %arg11[%c0_37, %c0_38] : memref<32x64xf32, #tpu.memory_space<vmem>>, vector<32x64xf32>
    tpu.vector_store %arg11[%c0_37, %c0_38], %54 {strides = array<i32>} : memref<32x64xf32, #tpu.memory_space<vmem>>, vector<32x64xf32>,
    %c1_i32 = arith.constant 1 : i32
    %56 = arith.cmpi eq, %arg1, %c1_i32 : i32
    %57 = arith.extui %56 : i1 to i32
    %c0_i32_39 = arith.constant 0 : i32
    %58 = arith.cmpi ne, %57, %c0_i32_39 : i32
    scf.if %58 {
      %c0_40 = arith.constant 0 : index
      %c0_41 = arith.constant 0 : index
      %c0_42 = arith.constant 0 : index
      %59 = vector.load %arg9[%c0_40, %c0_41, %c0_42] : memref<1x32x1xf32, #tpu.memory_space<vmem>>, vector<1x32x1xf32>
      %60 = vector.shape_cast %59 : vector<1x32x1xf32> to vector<32x1xf32>
      %cst_43 = arith.constant 0.000000e+00 : f32
      %cst_44 = arith.constant 1.000000e+00 : f32
      %61 = vector.broadcast %cst_43 : f32 to vector<32x1xf32>
      %62 = arith.maximumf %61, %60 : vector<32x1xf32>
      %63 = vector.broadcast %cst_44 : f32 to vector<32x1xf32>
      %64 = arith.minimumf %63, %62 : vector<32x1xf32>
      %c0_45 = arith.constant 0 : index
      %c0_46 = arith.constant 0 : index
      %c0_47 = arith.constant 0 : index
      %65 = vector.load %arg9[%c0_45, %c0_46, %c0_47] : memref<1x32x1xf32, #tpu.memory_space<vmem>>, vector<1x32x1xf32>
      %66 = vector.shape_cast %65 : vector<1x32x1xf32> to vector<32x1xf32>
      %67 = vector.shape_cast %64 : vector<32x1xf32> to vector<1x32x1xf32>
      tpu.vector_store %arg9[%c0_45, %c0_46, %c0_47], %67 {strides = array<i32>} : memref<1x32x1xf32, #tpu.memory_space<vmem>>, vector<1x32x1xf32>,
      %c0_48 = arith.constant 0 : index
      %c0_49 = arith.constant 0 : index
      %68 = vector.load %arg11[%c0_48, %c0_49] : memref<32x64xf32, #tpu.memory_space<vmem>>, vector<32x64xf32>
      %69 = arith.truncf %68 : vector<32x64xf32> to vector<32x64xbf16>
      %c0_50 = arith.constant 0 : index
      %c0_51 = arith.constant 0 : index
      %c0_52 = arith.constant 0 : index
      %70 = vector.load %arg10[%c0_50, %c0_51, %c0_52] : memref<1x32x64xbf16, #tpu.memory_space<vmem>>, vector<1x32x64xbf16>
      %71 = vector.shape_cast %70 : vector<1x32x64xbf16> to vector<32x64xbf16>
      %72 = vector.shape_cast %69 : vector<32x64xbf16> to vector<1x32x64xbf16>
      tpu.vector_store %arg10[%c0_50, %c0_51, %c0_52], %72 {strides = array<i32>} : memref<1x32x64xbf16, #tpu.memory_space<vmem>>, vector<1x32x64xbf16>,
    } else {
    }
    return
  }
  func.func @transform_0(%arg0: i32, %arg1: i32) -> (i32, i32, i32) {
    %c0_i32 = arith.constant 0 : i32
    %c0_i32_0 = arith.constant 0 : i32
    %c0_i32_1 = arith.constant 0 : i32
    return %arg0, %c0_i32, %c0_i32_0 : i32, i32, i32
  }
  func.func @transform_1(%arg0: i32, %arg1: i32) -> (i32, i32, i32) {
    %c0_i32 = arith.constant 0 : i32
    %c0_i32_0 = arith.constant 0 : i32
    return %arg0, %arg1, %c0_i32 : i32, i32, i32
  }
  func.func @transform_2(%arg0: i32, %arg1: i32) -> (i32, i32, i32) {
    %c0_i32 = arith.constant 0 : i32
    %c0_i32_0 = arith.constant 0 : i32
    return %arg0, %arg1, %c0_i32 : i32, i32, i32
  }
  func.func @transform_3(%arg0: i32, %arg1: i32) -> (i32, i32) {
    %c0_i32 = arith.constant 0 : i32
    %c0_i32_0 = arith.constant 0 : i32
    %c0_i32_1 = arith.constant 0 : i32
    return %c0_i32, %c0_i32_0 : i32, i32
  }
  func.func @transform_4(%arg0: i32, %arg1: i32) -> (i32, i32) {
    %c0_i32 = arith.constant 0 : i32
    %c0_i32_0 = arith.constant 0 : i32
    %c0_i32_1 = arith.constant 0 : i32
    return %c0_i32, %c0_i32_0 : i32, i32
  }
  func.func @transform_5(%arg0: i32, %arg1: i32) -> (i32, i32, i32) {
    %c0_i32 = arith.constant 0 : i32
    %c0_i32_0 = arith.constant 0 : i32
    return %arg0, %arg1, %c0_i32 : i32, i32, i32
  }
  func.func @transform_6(%arg0: i32, %arg1: i32) -> (i32, i32, i32) {
    %c0_i32 = arith.constant 0 : i32
    %c0_i32_0 = arith.constant 0 : i32
    %c0_i32_1 = arith.constant 0 : i32
    return %arg0, %c0_i32, %c0_i32_0 : i32, i32, i32
  }
  func.func @transform_7(%arg0: i32, %arg1: i32) -> (i32, i32, i32) {
    %c0_i32 = arith.constant 0 : i32
    %c0_i32_0 = arith.constant 0 : i32
    %c0_i32_1 = arith.constant 0 : i32
    return %arg0, %c0_i32, %c0_i32_0 : i32, i32, i32
  }
  func.func @transform_8(%arg0: i32, %arg1: i32) -> (i32, i32, i32) {
    %c0_i32 = arith.constant 0 : i32
    %c0_i32_0 = arith.constant 0 : i32
    %c0_i32_1 = arith.constant 0 : i32
    return %arg0, %c0_i32, %c0_i32_0 : i32, i32, i32
  }
}

</mosaic_0001>

<bundles_post_ra>
// kernel: tpu_custom_call.1
= control target key start
LH: loop header
LB: loop body
LE: loop exit
PB: predicated region body
PF: predicated region fallthrough
CT: control target
= control target key end

     0   :  { %s2171_s0 = inlined_call_operand.vmem [shape: bf16[2,64,32], index: 0, kind: input, shape index: {}]   ;;  %s2172_s1 = inlined_call_operand.vmem [shape: bf16[2,64,64], index: 1, kind: input, shape index: {}]   ;;  %s2173_s2 = inlined_call_operand.vmem [shape: f32[2,64,1], index: 2, kind: input, shape index: {}]   ;;  %s2174_s3 = inlined_call_operand.vmem [shape: bf16[32,64], index: 3, kind: input, shape index: {}]   ;;  %s2175_s4 = inlined_call_operand.vmem [shape: f32[1,64], index: 4, kind: input, shape index: {}]   ;;  %s2176_s5 = inlined_call_operand.vmem [shape: bf16[2,64,32], index: 5, kind: output, shape index: {0}]   ;;  %s2177_s6 = inlined_call_operand.hbm [shape: f32[2,32,32], index: 6, kind: output, shape index: {1}]   ;;  %s2178_s7 = inlined_call_operand.vmem [shape: f32[2,32,1], index: 7, kind: output, shape index: {2}]   ;;  %s2179_s8 = inlined_call_operand.hbm [shape: bf16[2,32,64], index: 8, kind: output, shape index: {3}]  }
   0x1   :  { %2191 = sst [smem:[#allocation19_spill]] %s2171_s0 }
   0x2   :  { %2192 = sst [smem:[#allocation20_spill]] %s2177_s6 }
   0x3   :  { %2193 = sst [smem:[#allocation21_spill]] %s2179_s8 }
   0x4   :  { %14 = vsyncpa [#allocation4], 0 }
   0x5   :  { %16 = vsyncpa [#allocation4 + $0x1], 0 }
   0x6   :  { %17 = vsyncpa [#allocation6], 0 }
   0x7   :  { %19 = vsyncpa [#allocation6 + $0x1], 0  ;;  %s1826_s27 = smov 0   ;;  %s1828_s28 = smov 0  }
   0x8   :  { %s1830_s29 = smov 0   ;;  %s1832_s30 = smov 0  }
   0x9   :  { %s1834_s9 = smov 0   ;;  %s1836_s10 = smov 0  }
   0xa   :  { %s1838_s11 = smov 0   ;;  %s1840_s12 = smov 0  }
   0xb LB: > { %2194 = sst [smem:[#allocation9_spill]] %s1742_s27  ;;  %s1379_s13 = sadd.s32 4294967295, %s1770_s12   ;;  %s1770_s12 = sphi %s1840_s12, %s25_s12   ;;  %s1766_s11 = sphi %s1838_s11, %s2218_s11   ;;  %s1762_s10 = sphi %s1836_s10, %s2217_s10   ;;  %s1758_s9 = sphi %s1834_s9, %s2216_s9   ;;  %s1754_s30 = sphi %s1832_s30, %s2215_s30   ;;  %s1750_s29 = sphi %s1830_s29, %s2214_s29   ;;  %s1746_s28 = sphi %s1828_s28, %s2213_s28   ;;  %s1742_s27 = sphi %s1826_s27, %s2212_s27  }
   0xc   : > { %2195 = sst [smem:[#allocation10_spill]] %s1746_s28  ;;  %s1380_s14 = sadd.s32 4294967294, %s1770_s12  }
   0xd   : > { %2196 = sst [smem:[#allocation11_spill]] %s1750_s29  ;;  %s34_s15 = sadd.s32 1, %s1762_s10 }
   0xe   : > { %2197 = sst [smem:[#allocation12_spill]] %s1762_s10  ;;  %p35_p0 = scmp.ge.s32.totalorder %s34_s15, 2 }
   0xf   : > { %2198 = sst [smem:[#allocation13_spill]] %s1766_s11  ;;  %s37_s16 = sadd.s32 1, %s1766_s11 }
  0x10   : > { %2199 = sst [smem:[#allocation14_spill]] %s1770_s12  ;;  %p206_p1 = scmp.ne.s32.totalorder %s1750_s29, %s1746_s28 }
  0x11   : > { %p207_p2 = scmp.eq.s32.totalorder %s1379_s13, 3  ;;  %s2220_s15 = smov (%p35_p0, %s34_s15), 0 }
  0x12   : > { %2200 = sst [smem:[#allocation15_spill]] %s2220_s15  ;;  %s2222_s16 = smov (!%p35_p0, %s37_s16), %s1766_s11 }
  0x13   : > { %p1875_p3 = por %p207_p2, %p206_p1  ;;  %p212_p4 = scmp.ne.s32.totalorder %s1746_s28, %s1742_s27 }
  0x14   : > { %p39_p5 = scmp.ge.s32.totalorder %s2222_s16, 2  ;;  %p213_p6 = scmp.eq.s32.totalorder %s1380_s14, 3 }
  0x15   : > { %p1383_p7 = scmp.ge.s32.totalorder %s1770_s12, 1  ;;  %p323_p8 = scmp.lt.s32.totalorder %s1770_s12, 5 }
  0x16   : > { %s2224_s16 = smov (%p39_p5, %s2222_s16), 0  ;;  %p1885_p9 = por %p213_p6, %p212_p4 }
  0x17   : > { %2202 = sst [smem:[#allocation16_spill]] %s2224_s16  ;;  %p324_p10 = pnand %p1383_p7, %p323_p8 }
  0x18   : > { %s2203_s18 = scalar_select %p1885_p9, 1, 0 }
  0x19   : > { %s193_s19 = ssub.s32 %s1766_s11, %s2224_s16  ;;  %s196_s20 = sadd.s32 1, %s1750_s29 }
  0x1a   : > { %2204 = sst [smem:[#allocation17_spill]] %s2203_s18  ;;  %p194_p11 = scmp.eq.s32.totalorder %s193_s19, 0 }
  0x1b   : > { %327 = sbr.rel (%p324_p10) target bundleno = 1477 (0x5c5), region = 40  ;;  %s1896_s22 = sand.u32 (!%p324_p10), 1, %s1746_s28  }
  0x1c   : > { %s1893_s21 = scalar_select %p194_p11, %s1750_s29, %s196_s20  }
  0x1d   : > { %p394_p12 = scmp.lt.s32.totalorder (!%p324_p10), %s1758_s9, 1  ;;  %s1384_s23 = sshll.u32 (!%p324_p10), %s1896_s22, 5 }
  0x1e   : > { %2205 = sst [smem:[#allocation18_spill]] %s1893_s21  ;;  %s1385_s24 = sshll.u32 (!%p324_p10), %s1896_s22, 4 }
  0x1f   : > { %s1388_s26 = sshll.u32 (!%p324_p10), %s1754_s30, 2  ;;  %s2206_s0 = sld [smem:[#allocation19_spill]] (!%p324_p10) }
  0x20   : > { %p402_p13 = scmp.lt.s32.totalorder (!%p324_p10), %s1388_s26, 7  ;;  %s1928_s11 = scalar_lea.vmem (!%p324_p10), [#allocation3], %s1384_s23 }
  0x21   : > { %s1930_s15 = scalar_lea.vmem (!%p324_p10), [#allocation5], %s1385_s24  ;;  %p1399_p0 = scmp.ne.s32.totalorder (!%p324_p10), %s1754_s30, 0 }
  0x22   : > { %s395_s25 = scalar_select %p394_p12, %s1758_s9, 1 }
  0x23   : > { %s2226_s26 = smov (!%p402_p13, %s1388_s26), 7  ;;  %438 = sbr.rel (%p1399_p0) target bundleno = 43 (0x2b), region = 44 }
  0x24   : > { %s1438_s13 = sshll.u32 %s395_s25, 5  ;;  %s1389_s16 = sshll.u32 %s395_s25, 3  ;;  %vm439_vm0 = vcmask (!%p1399_p0), 261120   ;;  %vm444_vm1 = vcmask (!%p1399_p0), 7168   ;;  %vm449_vm2 = vcmask (!%p1399_p0), 523264   ;;  %v1772_v0 = vmov (!%p1399_p0), 0.0  }
  0x25   : > { %s1906_s20 = scalar_lea.vmem %s2206_s0, %s1438_s13  ;;  %s1911_s10 = scalar_lea.vmem %s2178_s7, %s1438_s13  ;;  %440 = vst.msk [vmem:[%s1928_s11] sm:$0xff] (!%p1399_p0), %vm439_vm0, %v1772_v0  ;;  %441 = vst.msk [vmem:[%s1928_s11 + $0x8] sm:$0xff] (!%p1399_p0), %vm439_vm0, %v1772_v0 }
  0x26   : > { %s405_s21 = sadd.s32 %s1389_s16, %s2226_s26  ;;  %442 = vst.msk [vmem:[%s1928_s11 + $0x10] sm:$0xff] (!%p1399_p0), %vm439_vm0, %v1772_v0  ;;  %443 = vst.msk [vmem:[%s1928_s11 + $0x18] sm:$0xff] (!%p1399_p0), %vm439_vm0, %v1772_v0 }
  0x27   : > { %s1390_s29 = sshll.u32 %s405_s21, 2  ;;  %s1393_s28 = sshll.u32 %s405_s21, 3  ;;  %445 = vst.msk [vmem:[%s1911_s10] sm:$0xff] (!%p1399_p0), %vm444_vm1, %v1772_v0  ;;  %446 = vst.msk [vmem:[%s1911_s10 + $0x8] sm:$0xff] (!%p1399_p0), %vm444_vm1, %v1772_v0 }
  0x28   : > { %s1916_s12 = scalar_lea.vmem %s2172_s1, %s1390_s29  ;;  %s1921_s14 = scalar_lea.vmem %s2173_s2, %s1393_s28  ;;  %447 = vst.msk [vmem:[%s1911_s10 + $0x10] sm:$0xff] (!%p1399_p0), %vm444_vm1, %v1772_v0  ;;  %448 = vst.msk [vmem:[%s1911_s10 + $0x18] sm:$0xff] (!%p1399_p0), %vm444_vm1, %v1772_v0 }
  0x29   : > { %s1926_s0 = scalar_lea.vmem %s2176_s5, %s1390_s29  ;;  %450 = vst.msk [vmem:[#allocation2] sm:$0xff] (!%p1399_p0), %vm449_vm2, %v1772_v0  ;;  %451 = vst.msk [vmem:[#allocation2 + $0x8] sm:$0xff] (!%p1399_p0), %vm449_vm2, %v1772_v0 }
  0x2a   : > { %452 = vst.msk [vmem:[#allocation2 + $0x10] sm:$0xff] %vm449_vm2, %v1772_v0  ;;  %453 = vst.msk [vmem:[#allocation2 + $0x18] sm:$0xff] %vm449_vm2, %v1772_v0 }
  0x2b PF: > { %v1620_v1 = vld [vmem:[%s1906_s20] sm:$0xff]   ;;  %v1621_v2 = vld [vmem:[%s1906_s20 + $0x8] sm:$0xff]   ;;  %v1622_v3 = vld [vmem:[%s1906_s20 + $0x10] sm:$0xff]   ;;  %vm504_vm3 = vcmask 523264   ;;  %vm585_vm4 = vcmask 261120   ;;  %vm669_vm5 = vcmask 523520  }
  0x2c   : > { %1476 = vmatprep.subr.bf16.mxu0 %v1620_v1  ;;  %v1945_v4 = vld [vmem:[%s1916_s12] sm:$0xff]   ;;  %v1623_v6 = vld [vmem:[%s1906_s20 + $0x18] sm:$0xff]   ;;  %v1954_v7 = vld [vmem:[%s1916_s12 + $0x8] sm:$0xff]   ;;  %v1773_v28 = vmov 0   ;;  %s1774_s16 = smov 96   ;;  %vm758_vm6 = vcmask 257024  }
  0x2d   : > { %1477 = vmatpush3.bf16.msra.mxu0 %v1620_v1  ;;  %1484 = vmatprep.mubr.msk.bf16.mxu0 %vm504_vm3, %v1945_v4  ;;  %v1626_v5 = vld [vmem:[%s2174_s3] sm:$0xff]   ;;  %v1627_v8 = vld [vmem:[%s2174_s3 + $0x8] sm:$0xff]   ;;  %v468_v46 = vld [vmem:[%s1921_s14 + $0x10] sm:$0xff]  ;;  %vm1007_vm7 = vcmask 7168   ;;  %p1425_p1 = scmp.ne.s32.totalorder %s1754_s30, 1 }
  0x2e   : > { %1478 = vmatprep.subr.bf16.mxu0 %v1621_v2  ;;  %1488 = vmatprep.subr.bf16.mxu1 %v1626_v5  ;;  %v1408_v15 = vld [vmem:[%s2175_s4] ss:$0 sm:$0xff]  ;;  %v467_v45 = vld [vmem:[%s1921_s14 + $0x8] sm:$0xff]  ;;  %v469_v47 = vld [vmem:[%s1921_s14 + $0x18] sm:$0xff]  ;;  %vm1115_vm8 = vcmask (!%p1425_p1), 519168  }
  0x2f   : > { %1489 = vmatpush3.bf16.msra.mxu1 %v1626_v5  ;;  %1619 = vset.pattern.permute.xlu1 %v1773_v28  ;;  %v466_v48 = vld [vmem:[%s1921_s14] sm:$0xff]  ;;  %v1530_v49 = vpack.c.bf16 %v469_v47, %v468_v46 }
  0x30   : > { %1490 = vmatprep.subr.bf16.mxu1 %v1627_v8  ;;  %1618 = vset.pattern.permute.xlu0 %v1773_v28  ;;  %v1526_v50 = vpack.c.bf16 %v467_v45, %v466_v48 }
  0x31   : > { %1479 = vmatpush3.bf16.msra.mxu0 %v1621_v2 }
  0x32   : > { %1480 = vmatprep.subr.bf16.mxu0 %v1622_v3 }
  0x33   : > { %1491 = vmatpush3.bf16.msra.mxu1 %v1627_v8 }
  0x35   : > { %1481 = vmatpush3.bf16.msra.mxu0 %v1622_v3 }
  0x36   : > { %1482 = vmatprep.subr.bf16.mxu0 %v1623_v6 }
  0x39   : > { %1483 = vmatpush3.bf16.msra.mxu0 %v1623_v6 }
  0x3a   : > { %1527 = vmatprep.subr.bf16.mxu0 %v1526_v50 }
  0x3c   : > { %1485 = vmatmul.mubr.msk.bf16.vlgmr.msra.gmra.mrb[0].mxu0 %vm504_vm3, %v1954_v7 }
  0x3d   : > { %1529 = vmatpush3.bf16.msra.mxu0 %v1526_v50  ;;  %v766_v50 = vld [vmem:[%s1928_s11 + $0x18] sm:$0xff] }
  0x3e   : > { %1531 = vmatprep.subr.bf16.mxu0 %v1530_v49 }
  0x41   : > { %1533 = vmatpush3.bf16.msra.mxu0 %v1530_v49 }
 0x10f   : > { %v1486_v9 = vpop.f32.mrb[0].mxu0 }
 0x110   : > { %v545_v10 = vpop.f32.mrb[1].mxu0 }
 0x111   : > { %v1487_v11 = vpop.f32.mrb[2].mxu0 }
 0x112   : > { %v561_v12 = vpack.c.bf16 %v1487_v11, %v1486_v9  ;;  %v548_v13 = vpop.f32.mrb[3].mxu0 }
 0x113   : > { %v560_v14 = vpack.c.bf16 %v548_v13, %v545_v10 }
 0x115   : > { %1492 = vmatprep.mubr.msk.bf16.mxu1 %vm585_vm4, %v560_v14 }
 0x116   : > { %1493 = vmatmul.mubr.msk.bf16.vlgmr.msra.gmra.mrb[0].mxu1 %vm585_vm4, %v561_v12 }
 0x1e9   : > { %v1494_v16 = vpop.f32.mrb[0].mxu1 }
 0x1ea   : > { %v1966_v17 = vadd.f32 %v1494_v16, %v1408_v15  ;;  %v626_v18 = vpop.f32.mrb[1].mxu1 }
 0x1eb   : > { %v1968_v19 = vadd.f32 %v1408_v15, %v626_v18  ;;  %v1495_v20 = vpop.f32.mrb[2].mxu1 }
 0x1ec   : > { %v1970_v21 = vadd.f32 %v1495_v20, %v1408_v15  ;;  %v629_v22 = vpop.f32.mrb[3].mxu1  ;;  %v676_v23 = vsel %vm669_vm5, %v1966_v17, -inf  ;;  %v643_v12 = vmax.f32 %v1966_v17, 0.0 }
 0x1ed   : > { %v1973_v24 = vadd.f32 %v1408_v15, %v629_v22  ;;  %677 = vmax.xlane.f32.xlu1 %v676_v23  ;;  %v670_v25 = vsel %vm669_vm5, %v1968_v19, -inf  ;;  %v641_v6 = vmax.f32 %v1968_v19, 0.0 }
 0x1ee   : > { %671 = vmax.xlane.f32.xlu0 %v670_v25  ;;  %v679_v26 = vsel %vm669_vm5, %v1970_v21, -inf  ;;  %v644_v5 = vmax.f32 %v1970_v21, 0.0 }
 0x1ef   : > { %v673_v27 = vsel %vm669_vm5, %v1973_v24, -inf  ;;  %v642_v3 = vmax.f32 %v1973_v24, 0.0 }
 0x1f1   : > { %680 = vmax.xlane.f32.xlu1 %v679_v26 }
 0x1f2   : > { %674 = vmax.xlane.f32.xlu0 %v673_v27 }
 0x27a   : > { %v678_v29 = vpop.xlane.xlu1 %677 }
 0x27b   : > { %v684_v30 = vsub.f32 %v1966_v17, %v678_v29  ;;  %v672_v31 = vpop.xlane.xlu0 %671 }
 0x27c   : > { %v682_v32 = vsub.f32 %v1968_v19, %v672_v31 }
 0x27d   : > { %v690_v33 = vmul.f32 1.442695, %v684_v30 }
 0x27e   : > { %v686_v34 = vmul.f32 1.442695, %v682_v32  ;;  %v681_v35 = vpop.xlane.xlu1 %680 }
 0x27f   : > { %1628 = vpow2.f32 %v690_v33  ;;  %v675_v36 = vpop.xlane.xlu0 %674  ;;  %v685_v37 = vsub.f32 %v1970_v21, %v681_v35 }
 0x280   : > { %1630 = vpow2.f32 %v686_v34  ;;  %v683_v38 = vsub.f32 %v1973_v24, %v675_v36 }
 0x281   : > { %v692_v40 = vmul.f32 1.442695, %v685_v37 }
 0x282   : > { %v688_v39 = vmul.f32 1.442695, %v683_v38 }
 0x284   : > { %1632 = vpow2.f32 %v688_v39 }
 0x285   : > { %1634 = vpow2.f32 %v692_v40 }
 0x289   : > { %v1629_v41 = vpop.eup %1628 }
 0x28a   : > { %v1631_v42 = vpop.eup %1630  ;;  %702 = vrot.lane.b32.xlu1 %v1629_v41, %s1774_s16 }
 0x28b   : > { %698 = vrot.lane.b32.xlu0 %v1631_v42, %s1774_s16 }
 0x28e   : > { %v1633_v43 = vpop.eup %1632 }
 0x28f   : > { %700 = vrot.lane.b32.xlu1 %v1633_v43, %s1774_s16  ;;  %v1635_v44 = vpop.eup %1634 }
 0x293   : > { %704 = vrot.lane.b32.xlu1 %v1635_v44, %s1774_s16 }
 0x297   : > { %652 = vperm.xlu1 %1619, %v467_v45  }
 0x29b   : > { %657 = vperm.xlu1 %1619, %v468_v46  }
 0x2fc   : > { %v703_v51 = vpop.permute.xlu1 %702 }
 0x2fd   : > { %v716_v52 = vsel %vm585_vm4, %v703_v51, 0.0  ;;  %v699_v53 = vpop.permute.xlu0 %698 }
 0x2fe   : > { %717 = vadd.xlane.f32.xlu0 %v716_v52  ;;  %v710_v55 = vsel %vm585_vm4, %v699_v53, 0.0  ;;  %v764_v53 = vld [vmem:[%s1928_s11 + $0x8] sm:$0xff] }
 0x301   : > { %v701_v54 = vpop.permute.xlu1 %700 }
 0x302   : > { %711 = vadd.xlane.f32.xlu0 %v710_v55  ;;  %v713_v56 = vsel %vm585_vm4, %v701_v54, 0.0 }
 0x303   : > { %714 = vadd.xlane.f32.xlu1 %v713_v56 }
 0x305   : > { %v705_v57 = vpop.permute.xlu1 %704 }
 0x306   : > { %v719_v58 = vsel %vm585_vm4, %v705_v57, 0.0 }
 0x307   : > { %720 = vadd.xlane.f32.xlu0 %v719_v58 }
 0x314   : > { %662 = vperm.xlu1 %1619, %v469_v47   ;;  %v765_v47 = vld [vmem:[%s1928_s11 + $0x10] sm:$0xff] }
 0x316   : > { %v653_v59 = vpop.permute.xlu1 %652 }
 0x317   : > { %v666_v11 = vmul.f32 %v653_v59, %v642_v3 }
 0x31a   : > { %v658_v61 = vpop.permute.xlu1 %657 }
 0x31b   : > { %v667_v18 = vmul.f32 %v658_v61, %v643_v12 }
 0x31d   : > { %647 = vperm.xlu0 %1618, %v466_v48   ;;  %v763_v48 = vld [vmem:[%s1928_s11] sm:$0xff] }
 0x38b   : > { %v718_v60 = vpop.xlane.xlu0 %717 }
 0x38c   : > { %1636 = vrcp.f32 %v718_v60  ;;  %v1012_v60 = vld [vmem:[#allocation2] sm:$0xff] }
 0x38f   : > { %v712_v62 = vpop.xlane.xlu0 %711 }
 0x390   : > { %v715_v63 = vpop.xlane.xlu1 %714  ;;  %1638 = vrcp.f32 %v712_v62  ;;  %v1015_v62 = vld [vmem:[#allocation2 + $0x18] sm:$0xff] }
 0x391   : > { %1640 = vrcp.f32 %v715_v63 }
 0x394   : > { %v721_v0 = vpop.xlane.xlu0 %720  ;;  %v663_v1 = vpop.permute.xlu1 %662 }
 0x395   : > { %1642 = vrcp.f32 %v721_v0  ;;  %v668_v13 = vmul.f32 %v663_v1, %v644_v5 }
 0x396   : > { %v1637_v2 = vpop.eup %1636 }
 0x397   : > { %v727_v15 = vmul.f32 %v1637_v2, %v1629_v41  ;;  %v768_v24 = vpack.c.bf16 %v668_v13, %v667_v18 }
 0x399   : > { %v732_v19 = vmul.f32 %v727_v15, %v658_v61  ;;  %v857_v15 = vld [vmem:[%s1911_s10 + $0x18] sm:$0xff] }
 0x39a   : > { %v1639_v8 = vpop.eup %1638 }
 0x39b   : > { %v1641_v10 = vpop.eup %1640  ;;  %v723_v22 = vmul.f32 %v1639_v8, %v1631_v42  ;;  %v1442_v38 = vpack.c.bf16 %v732_v19, %v732_v19 }
 0x39c   : > { %v648_v9 = vpop.permute.xlu0 %647  ;;  %v725_v25 = vmul.f32 %v1641_v10, %v1633_v43  ;;  %v854_v10 = vld [vmem:[%s1911_s10] sm:$0xff] }
 0x39d   : > { %v665_v14 = vmul.f32 %v648_v9, %v641_v6  ;;  %v730_v26 = vmul.f32 %v723_v22, %v648_v9  ;;  %v855_v9 = vld [vmem:[%s1911_s10 + $0x8] sm:$0xff] }
 0x39e   : > { %v731_v17 = vmul.f32 %v725_v25, %v653_v59  ;;  %v1014_v59 = vld [vmem:[#allocation2 + $0x10] sm:$0xff] }
 0x39f   : > { %v1643_v16 = vpop.eup %1642  ;;  %v767_v20 = vpack.c.bf16 %v666_v11, %v665_v14  ;;  %v1440_v32 = vpack.c.bf16 %v730_v26, %v730_v26 }
 0x3a0   : > { %v729_v23 = vmul.f32 %v1643_v16, %v1635_v44  ;;  %v734_v28 = vpack.c.bf16 %v731_v17, %v730_v26  ;;  %v1441_v34 = vpack.c.bf16 %v731_v17, %v731_v17  ;;  %v856_v16 = vld [vmem:[%s1911_s10 + $0x10] sm:$0xff] }
 0x3a1   : > { %1496 = vmatprep.subr.bf16.mxu1 %v767_v20 }
 0x3a2   : > { %1497 = vmatpush3.bf16.msra.mxu1 %v767_v20  ;;  %v733_v21 = vmul.f32 %v729_v23, %v663_v1  ;;  %v1013_v1 = vld [vmem:[#allocation2 + $0x8] sm:$0xff] }
 0x3a3   : > { %1498 = vmatprep.subr.bf16.mxu1 %v768_v24 }
 0x3a4   : > { %868 = vrot.lane.b32.xlu0 %v733_v21, %s1774_s16  ;;  %v735_v27 = vpack.c.bf16 %v733_v21, %v732_v19  ;;  %v1443_v36 = vpack.c.bf16 %v733_v21, %v733_v21 }
 0x3a6   : > { %771 = vrot.lane.b32.xlu1 %v735_v27, %s1774_s16  ;;  %1499 = vmatpush3.bf16.msra.mxu1 %v768_v24 }
 0x3a7   : > { %1518 = vmatprep.subr.bf16.mxu1 %v1945_v4 }
 0x3aa   : > { %769 = vrot.lane.b32.xlu1 %v734_v28, %s1774_s16 }
 0x3ae   : > { %862 = vrot.lane.b32.xlu1 %v730_v26, %s1774_s16 }
 0x3b2   : > { %864 = vrot.lane.b32.xlu1 %v731_v17, %s1774_s16 }
 0x3b6   : > { %866 = vrot.lane.b32.xlu1 %v732_v19, %s1774_s16 }
 0x416   : > { %v869_v37 = vpop.permute.xlu0 %868 }
 0x418   : > { %v772_v29 = vpop.permute.xlu1 %771 }
 0x41c   : > { %v770_v30 = vpop.permute.xlu1 %769 }
 0x41d   : > { %775 = vxpose.xlu1.c.b16.start [1/2] (short) (narrow) %v770_v30, 32 }
 0x420   : > { %v863_v31 = vpop.permute.xlu1 %862 }
 0x421   : > { %776 = vxpose.xlu1.c.b16.end [2/2] (short) (narrow) %v772_v29, 32  ;;  %874 = vxpose.xlu0.b32.start [1/4] (short) (narrow) %v863_v31, 32 }
 0x424   : > { %v865_v33 = vpop.permute.xlu1 %864 }
 0x425   : > { %746 = vrot.lane.b32.xlu1 %v1440_v32, %s1774_s16  ;;  %875 = vxpose.xlu0.b32.cont [2/4] (short) (narrow) %v865_v33, 32 }
 0x428   : > { %v867_v35 = vpop.permute.xlu1 %866 }
 0x429   : > { %748 = vrot.lane.b32.xlu1 %v1441_v34, %s1774_s16  ;;  %876 = vxpose.xlu0.b32.cont [3/4] (short) (narrow) %v867_v35, 32 }
 0x42d   : > { %752 = vrot.lane.b32.xlu1 %v1443_v36, %s1774_s16  ;;  %877 = vxpose.xlu0.b32.end [4/4] (short) (narrow) %v869_v37, 32 }
 0x456   : > { %750 = vrot.lane.b32.xlu0 %v1442_v38, %s1774_s16 }
 0x483   : > { %v783_v39 = vpop.trf.xlu1 }
 0x484   : > { %1500 = vmatprep.mubr.msk.bf16.mxu1 %vm585_vm4, %v783_v39 }
 0x487   : > { %v784_v40 = vpop.trf.xlu1 }
 0x488   : > { %1501 = vmatmul.mubr.msk.bf16.vlgmr.msra.gmra.mrb[4].mxu1 %vm585_vm4, %v784_v40 }
 0x489   : > { %1519 = vmatpush3.bf16.msra.mxu1 %v1945_v4  ;;  %1522 = vmatprep.mubr.msk.bf16.mxu1 %vm585_vm4, %v783_v39 }
 0x48a   : > { %1520 = vmatprep.subr.bf16.mxu1 %v1954_v7 }
 0x48d   : > { %1521 = vmatpush3.bf16.msra.mxu1 %v1954_v7 }
 0x490   : > { %1523 = vmatmul.mubr.msk.bf16.vlgmr.msra.gmra.mrb[8].mxu1 %vm585_vm4, %v784_v40 }
 0x497   : > { %v747_v41 = vpop.permute.xlu1 %746 }
 0x498   : > { %759 = vst.msk [vmem:[%s1926_s0] sm:$0xf] %vm758_vm6, %v747_v41 }
 0x49b   : > { %v749_v42 = vpop.permute.xlu1 %748 }
 0x49c   : > { %760 = vst.msk [vmem:[%s1926_s0 + $0x4] sm:$0xf] %vm758_vm6, %v749_v42 }
 0x49f   : > { %v753_v4 = vpop.permute.xlu1 %752 }
 0x4a0   : > { %762 = vst.msk [vmem:[%s1926_s0 + $0xc] sm:$0xf] %vm758_vm6, %v753_v4 }
 0x4a1   : > { %v890_v43 = vpop.trf.xlu0 }
 0x4a2   : > { %1512 = vmatprep.mubr.msk.f32.mxu0 %vm585_vm4, %v890_v43 }
 0x4a5   : > { %v891_v7 = vpop.trf.xlu0 }
 0x4a6   : > { %1513 = vmatmul.mubr.msk.f32.vlgmr.msra.gmra.mrb[4].mxu0 %vm585_vm4, %v891_v7 }
 0x4a9   : > { %v892_v44 = vpop.trf.xlu0 }
 0x4aa   : > { %1515 = vmatprep.mubr.msk.f32.mxu0 %vm585_vm4, %v892_v44 }
 0x4ad   : > { %v893_v45 = vpop.trf.xlu0 }
 0x4ae   : > { %1516 = vmatmul.mubr.msk.f32.gmra.mrb[6].mxu0 %vm585_vm4, %v893_v45 }
 0x4c8   : > { %v751_v46 = vpop.permute.xlu0 %750 }
 0x4c9   : > { %761 = vst.msk [vmem:[%s1926_s0 + $0x8] sm:$0xf] %vm758_vm6, %v751_v46 }
 0x55b   : > { %v1502_v49 = vpop.f32.mrb[4].mxu1 }
 0x55c   : > { %v848_v51 = vadd.f32 %v1502_v49, %v765_v47  ;;  %v831_v52 = vpop.f32.mrb[5].mxu1 }
 0x55d   : > { %v846_v54 = vadd.f32 %v831_v52, %v763_v48  ;;  %v1503_v55 = vpop.f32.mrb[6].mxu1 }
 0x55e   : > { %852 = vst.msk [vmem:[%s1928_s11 + $0x10] sm:$0xff] %vm585_vm4, %v848_v51  ;;  %v849_v56 = vadd.f32 %v1503_v55, %v766_v50  ;;  %v834_v57 = vpop.f32.mrb[7].mxu1 }
 0x55f   : > { %850 = vst.msk [vmem:[%s1928_s11] sm:$0xff] %vm585_vm4, %v846_v54  ;;  %v847_v58 = vadd.f32 %v834_v57, %v764_v53 }
 0x560   : > { %853 = vst.msk [vmem:[%s1928_s11 + $0x18] sm:$0xff] %vm585_vm4, %v849_v56 }
 0x561   : > { %851 = vst.msk [vmem:[%s1928_s11 + $0x8] sm:$0xff] %vm585_vm4, %v847_v58 }
 0x563   : > { %v1524_v61 = vpop.f32.mrb[8].mxu1 }
 0x564   : > { %v1069_v63 = vadd.f32 %v1524_v61, %v1014_v59  ;;  %v1052_v0 = vpop.f32.mrb[9].mxu1 }
 0x565   : > { %v1067_v2 = vadd.f32 %v1052_v0, %v1012_v60  ;;  %v1525_v3 = vpop.f32.mrb[10].mxu1 }
 0x566   : > { %1073 = vst.msk [vmem:[#allocation2 + $0x10] sm:$0xff] %vm504_vm3, %v1069_v63  ;;  %v1070_v5 = vadd.f32 %v1525_v3, %v1015_v62  ;;  %v1055_v6 = vpop.f32.mrb[11].mxu1 }
 0x567   : > { %1071 = vst.msk [vmem:[#allocation2] sm:$0xff] %vm504_vm3, %v1067_v2  ;;  %v1068_v8 = vadd.f32 %v1055_v6, %v1013_v1 }
 0x568   : > { %1074 = vst.msk [vmem:[#allocation2 + $0x18] sm:$0xff] %vm504_vm3, %v1070_v5 }
 0x569   : > { %1072 = vst.msk [vmem:[#allocation2 + $0x8] sm:$0xff] %vm504_vm3, %v1068_v8 }
 0x56d   : > { %v1097_v33 = vld [vmem:[#allocation2 + $0x10] sm:$0xff] (!%p1425_p1) }
 0x56e   : > { %v1095_v28 = vld [vmem:[#allocation2] sm:$0xff] (!%p1425_p1)  ;;  %v1446_v38 = vpack.c.bf16 (!%p1425_p1), %v1097_v33, %v1097_v33 }
 0x56f   : > { %v1444_v31 = vpack.c.bf16 (!%p1425_p1), %v1095_v28, %v1095_v28  ;;  %v1098_v34 = vld [vmem:[#allocation2 + $0x18] sm:$0xff] (!%p1425_p1) }
 0x570   : > { %v1096_v29 = vld [vmem:[#allocation2 + $0x8] sm:$0xff] (!%p1425_p1)  ;;  %v1447_v40 = vpack.c.bf16 (!%p1425_p1), %v1098_v34, %v1098_v34  ;;  %1118 = vst.msk [vmem:[%s1930_s15 + $0x8] sm:$0xf] (!%p1425_p1), %vm1115_vm8, %v1446_v38 }
 0x571   : > { %v1445_v32 = vpack.c.bf16 (!%p1425_p1), %v1096_v29, %v1096_v29  ;;  %1116 = vst.msk [vmem:[%s1930_s15] sm:$0xf] (!%p1425_p1), %vm1115_vm8, %v1444_v31 }
 0x572   : > { %1119 = vst.msk [vmem:[%s1930_s15 + $0xc] sm:$0xf] (!%p1425_p1), %vm1115_vm8, %v1447_v40 }
 0x573   : > { %1117 = vst.msk [vmem:[%s1930_s15 + $0x4] sm:$0xf] (!%p1425_p1), %vm1115_vm8, %v1445_v32 }
 0x579   : > { %v1514_v11 = vpop.f32.mrb[4].mxu0 }
 0x57a   : > { %v1004_v12 = vadd.f32 %v1514_v11, %v855_v9  ;;  %v984_v13 = vpop.f32.mrb[5].mxu0 }
 0x57b   : > { %v1003_v14 = vadd.f32 %v984_v13, %v854_v10 }
 0x57c   : > { %1009 = vst.msk [vmem:[%s1911_s10 + $0x8] sm:$0xff] %vm1007_vm7, %v1004_v12 }
 0x57d   : > { %1008 = vst.msk [vmem:[%s1911_s10] sm:$0xff] %vm1007_vm7, %v1003_v14 }
 0x57f   : > { %1078 = sbr.rel (%p1425_p1) target bundleno = 1426 (0x592), region = 48 }
 0x581   : > { %v1517_v18 = vpop.f32.mrb[6].mxu0 }
 0x582   : > { %v1006_v20 = vadd.f32 %v1517_v18, %v857_v15  ;;  %v994_v22 = vpop.f32.mrb[7].mxu0 }
 0x583   : > { %v1005_v23 = vadd.f32 %v994_v22, %v856_v16  ;;  %v1080_v24 = vld [vmem:[%s1911_s10 + $0x8] sm:$0xff] (!%p1425_p1) }
 0x584   : > { %1011 = vst.msk [vmem:[%s1911_s10 + $0x18] sm:$0xff] %vm1007_vm7, %v1006_v20  ;;  %v1079_v25 = vld [vmem:[%s1911_s10] sm:$0xff] (!%p1425_p1)  ;;  %v1084_v26 = vmax.f32 (!%p1425_p1), %v1080_v24, 0.0 }
 0x585   : > { %1010 = vst.msk [vmem:[%s1911_s10 + $0x10] sm:$0xff] %vm1007_vm7, %v1005_v23  ;;  %v1083_v19 = vmax.f32 (!%p1425_p1), %v1079_v25, 0.0 }
 0x586   : > { %v1088_v36 = vmin.f32 %v1084_v26, 1.0 }
 0x587   : > { %v1087_v35 = vmin.f32 %v1083_v19, 1.0 }
 0x588   : > { %1092 = vst.msk [vmem:[%s1911_s10 + $0x8] sm:$0xff] %vm1007_vm7, %v1088_v36 }
 0x589   : > { %1091 = vst.msk [vmem:[%s1911_s10] sm:$0xff] %vm1007_vm7, %v1087_v35 }
 0x58b   : > { %v1082_v17 = vld [vmem:[%s1911_s10 + $0x18] sm:$0xff] }
 0x58c   : > { %v1081_v21 = vld [vmem:[%s1911_s10 + $0x10] sm:$0xff]  ;;  %v1086_v30 = vmax.f32 %v1082_v17, 0.0 }
 0x58d   : > { %v1085_v27 = vmax.f32 %v1081_v21, 0.0 }
 0x58e   : > { %v1090_v39 = vmin.f32 %v1086_v30, 1.0 }
 0x58f   : > { %v1089_v37 = vmin.f32 %v1085_v27, 1.0 }
 0x590   : > { %1094 = vst.msk [vmem:[%s1911_s10 + $0x18] sm:$0xff] %vm1007_vm7, %v1090_v39 }
 0x591   : > { %1093 = vst.msk [vmem:[%s1911_s10 + $0x10] sm:$0xff] %vm1007_vm7, %v1089_v37 }
 0x592 PF: > { %s1448_s0 = sshll.u32 %s1758_s9, 9  ;;  %s2207_s21 = sld [smem:[#allocation20_spill]] }
 0x593   : > { %s1157_s24 = sshll.u32 %s1928_s11, 4  ;;  %s1130_s10 = scalar_lea.sflag [#allocation4], %s1896_s22  ;;  %s2084_s24 = int_to_ptr.vmem [resolvable:$true] %s1157_s24 }
 0x594   : > { %s1644_s26 = scalar_lea.vmem %s2084_s24, 512  ;;  %s1775_s13 = smov [#allocation3]  }
 0x595   : > { %p1645_p2 = scmp.ne.s32.totalorder %s2084_s24, %s1644_s26  ;;  %s1648_s20 = sshll.u32 %s1775_s13, 4  ;;  %s1649_s20 = int_to_ptr.vmem [resolvable:$false] %s1648_s20 }
 0x596   : > { %s1650_s14 = scalar_lea.vmem %s1649_s20, 1024  ;;  %p1651_p6 = scmp.lt.s32.totalorder %s2084_s24, %s1649_s20 }
 0x597   : > { %p1646_p4 = pnand %p1645_p2, %p1875_p3  ;;  %p1652_p7 = scmp.lt.s32.totalorder %s1650_s14, %s1644_s26 }
 0x598   : > { %s2081_s23 = scalar_lea.hbm %s2207_s21, %s1448_s0 }
 0x599   : > { %p1647_p5 = pneg %p1646_p4  ;;  %p1653_p8 = por %p1652_p7, %p1651_p6 }
 0x59b   : > { %p1654_p10 = pnand %p1653_p8, %p1647_p5 }
 0x59d   : > { %1657 = shalt.err (!%p1654_p10)
}
 0x59e   : > { %s1658_s25 = scalar_lea.hbm %s2081_s23, 512  ;;  %s1662_s6 = scalar_lea.hbm %s2207_s21, 1024 }
 0x59f   : > { %p1659_p11 = scmp.ne.s32.totalorder %s2081_s23, %s1658_s25  ;;  %p1663_p0 = scmp.lt.u32.totalorder %s2081_s23, %s2207_s21 }
 0x5a0   : > { %p1664_p1 = scmp.lt.u32.totalorder %s1662_s6, %s1658_s25  ;;  %p1666_p4 = scmp.lt.u32.totalorder %s1658_s25, %s2081_s23 }
 0x5a1   : > { %p1660_p12 = pnand %p1659_p11, %p1875_p3 }
 0x5a2   : > { %p1665_p2 = por %p1664_p1, %p1663_p0 }
 0x5a3   : > { %p1661_p13 = pneg %p1660_p12 }
 0x5a4   : > { %p1667_p5 = por %p1666_p4, %p1665_p2 }
 0x5a6   : > { %p1668_p6 = pnand %p1667_p5, %p1661_p13 }
 0x5a8   : > { %1671 = shalt.err (!%p1668_p6)
}
 0x5a9   : > { %s1776_s28 = smov 128   ;;  %s1777_s29 = smov 8  }
 0x5aa   : > { %1534 = dma.vmem_to_hbm [thread:$0]  (%p1875_p3), %s2084_s24, 512, %s2081_s23, %s1130_s10, %s1776_s28, %s1776_s28, %s1777_s29  }
 0x5ab   : > { %s1449_s12 = sshll.u32 %s1758_s9, 8  ;;  %s1176_s16 = sshll.u32 %s1930_s15, 4  ;;  %s2117_s16 = int_to_ptr.vmem [resolvable:$true] %s1176_s16 }
 0x5ac   : > { %s2208_s18 = sld [smem:[#allocation21_spill]]  ;;  %s1140_s13 = scalar_lea.sflag [#allocation6], %s1896_s22 }
 0x5ad   : > { %s1672_s20 = scalar_lea.vmem %s2117_s16, 256  ;;  %s1778_s14 = smov [#allocation5]  }
 0x5ae   : > { %p1673_p7 = scmp.ne.s32.totalorder %s2117_s16, %s1672_s20  ;;  %s1676_s23 = sshll.u32 %s1778_s14, 4  ;;  %s1677_s23 = int_to_ptr.vmem [resolvable:$false] %s1676_s23 }
 0x5af   : > { %s1678_s9 = scalar_lea.vmem %s1677_s23, 512  ;;  %p1679_p11 = scmp.lt.s32.totalorder %s2117_s16, %s1677_s23 }
 0x5b0   : > { %p1674_p8 = pnand %p1673_p7, %p1875_p3  ;;  %p1680_p12 = scmp.lt.s32.totalorder %s1678_s9, %s1672_s20 }
 0x5b2   : > { %s2115_s26 = scalar_lea.hbm %s2208_s18, %s1449_s12  ;;  %p1675_p10 = pneg %p1674_p8 }
 0x5b3   : > { %p1681_p13 = por %p1680_p12, %p1679_p11 }
 0x5b5   : > { %p1682_p0 = pnand %p1681_p13, %p1675_p10 }
 0x5b7   : > { %1685 = shalt.err (!%p1682_p0)
}
 0x5b8   : > { %s1686_s15 = scalar_lea.hbm %s2115_s26, 256  ;;  %s1690_s25 = scalar_lea.hbm %s2208_s18, 512 }
 0x5b9   : > { %p1687_p1 = scmp.ne.s32.totalorder %s2115_s26, %s1686_s15  ;;  %p1691_p5 = scmp.lt.u32.totalorder %s2115_s26, %s2208_s18 }
 0x5ba   : > { %p1692_p6 = scmp.lt.u32.totalorder %s1690_s25, %s1686_s15  ;;  %p1694_p8 = scmp.lt.u32.totalorder %s1686_s15, %s2115_s26 }
 0x5bb   : > { %p1688_p2 = pnand %p1687_p1, %p1875_p3 }
 0x5bc   : > { %p1693_p7 = por %p1692_p6, %p1691_p5 }
 0x5bd   : > { %p1689_p4 = pneg %p1688_p2 }
 0x5be   : > { %p1695_p10 = por %p1694_p8, %p1693_p7 }
 0x5c0   : > { %p1696_p11 = pnand %p1695_p10, %p1689_p4 }
 0x5c2   : > { %1699 = shalt.err (!%p1696_p11)
}
 0x5c3   : > { %s1779_s6 = smov 64   ;;  %s1780_s8 = smov 4  }
 0x5c4   : > { %1535 = dma.vmem_to_hbm [thread:$0]  (%p1875_p3), %s2117_s16, 256, %s2115_s26, %s1140_s13, %s1779_s6, %s1779_s6, %s1780_s8  }
 0x5c5 PF: > { %s2209_s27 = sld [smem:[#allocation14_spill]]  ;;  %s2210_s28 = sld [smem:[#allocation9_spill]] }
 0x5cb   : > { %p1545_p12 = scmp.ge.s32.totalorder %s2209_s27, 2  ;;  %s1203_s12 = sand.u32 1, %s2210_s28  }
 0x5cc   : > { %s1204_s0 = scalar_lea.sflag [#allocation4], %s1203_s12 }
 0x5cd   : > { %p1539_p13 = pnand %p1545_p12, %p1885_p9 }
 0x5cf   : > { %1733 = dma.done.wait (!%p1539_p13), %s1204_s0, 512  }
 0x5d0   : > { %1735 = vsyncadd (!%p1539_p13), %s1204_s0, 4294966784  ;;  %s1221_s30 = scalar_lea.sflag [#allocation6], %s1203_s12 }
 0x5d1   : > { %1737 = dma.done.wait (!%p1539_p13), %s1221_s30, 256  }
 0x5d2   : > { %1739 = vsyncadd (!%p1539_p13), %s1221_s30, 4294967040  ;;  %s25_s12 = sadd.s32 1, %s2209_s27   ;;  %s2212_s27 = sld [smem:[#allocation10_spill]] }
 0x5d3   : > { %p22_p0 = scmp.ge.s32.totalorder %s25_s12, 6   ;;  %s2213_s28 = sld [smem:[#allocation11_spill]] }
 0x5d4   : > { %s2214_s29 = sld [smem:[#allocation18_spill]]  ;;  %s2215_s30 = sld [smem:[#allocation12_spill]] }
 0x5d5   : > { %s2216_s9 = sld [smem:[#allocation13_spill]]  ;;  %s2217_s10 = sld [smem:[#allocation15_spill]] }
 0x5d6   : > { %s2218_s11 = sld [smem:[#allocation16_spill]]  ;;  %24 = sbr.rel (!%p22_p0) target bundleno = 11 (0xb), region = 130 }
 0x5dd   :  { %1226 = vsyncpa [#allocation4], 1 }
 0x5de   :  { %1228 = vsyncpa [#allocation4 + $0x1], 1 }
 0x5df   :  { %1229 = vsyncpa [#allocation6], 1 }
 0x5e0   :  { %1231 = vsyncpa [#allocation6 + $0x1], 1 }

</bundles_post_ra>
